<compile_context>
chip_gen: v7x
topology: tpu7x:2x2x1
jax: 0.10.0
libtpu: 0.0.40
codegen_flags: <defaults>
</compile_context>

<pallas_src>
import math

import jax
import jax.numpy as jnp
from jax import lax
from jax.experimental import pallas as pl
from jax.experimental.pallas import tpu as pltpu


def _predictor_kernel(x_ref, mask_ref, w_ref, out_ref):
    # x_ref    : (tm, D)      VMEM  -- already-sliced rows (data[:, :-1] flattened)
    # mask_ref : (tm, 1)      VMEM  -- already-sliced mask (non_pad_mask[:, 1:] flattened), f32
    # w_ref    : (Tpad, D)    VMEM  -- weight in PyTorch (out, in) layout, zero-padded types
    # out_ref  : (tm, Tpad)   VMEM  -- lane-dense output tile
    x = x_ref[...]
    w = w_ref[...]
    # Contract D on both operands (x @ w.T) without materializing a transposed weight.
    logits = lax.dot_general(
        x, w,
        dimension_numbers=(((1,), (1,)), ((), ())),
        preferred_element_type=jnp.float32,
    )                                           # (tm, Tpad), f32 accumulate on MXU
    out_ref[...] = (logits * mask_ref[...]).astype(out_ref.dtype)


def predictor_forward(data, non_pad_mask, weight, *, compute_dtype=None, tm_max=512):
    """Pallas forward of Predictor.

    data:          (B, L, D)
    non_pad_mask:  (B, L, 1)
    weight:        (T, D)   (PyTorch nn.Linear layout)
    compute_dtype: optional cast for data/weight (e.g. jnp.bfloat16 on v6e/v7x);
                   accumulation is always f32, mask multiply stays f32.
    returns:       (B, L-1, T) in data.dtype
    """
    B, L, D = data.shape
    T = weight.shape[0]
    out_dtype = data.dtype

    # ---- Wrapper-side slicing (equivalent to slicing after the matmul) ----
    M = B * (L - 1)
    x = data[:, :-1, :].reshape(M, D)
    m = non_pad_mask[:, 1:, :].reshape(M, 1).astype(jnp.float32)

    if compute_dtype is not None:
        x = x.astype(compute_dtype)
        weight = weight.astype(compute_dtype)

    # ---- Lane-dense output: pad type axis to a multiple of 128 (zero rows of W) ----
    Tpad = max(128, ((T + 127) // 128) * 128)
    if Tpad != T:
        weight = jnp.pad(weight, ((0, Tpad - T), (0, 0)))

    # ---- Large row tiles: tm multiple of 8, up to tm_max; pad rows to a tile multiple ----
    tm = min(tm_max, ((M + 7) // 8) * 8)
    Mpad = ((M + tm - 1) // tm) * tm
    if Mpad != M:
        x = jnp.pad(x, ((0, Mpad - M), (0, 0)))
        m = jnp.pad(m, ((0, Mpad - M), (0, 0)))

    grid = (Mpad // tm,)
    out = pl.pallas_call(
        _predictor_kernel,
        out_shape=jax.ShapeDtypeStruct((Mpad, Tpad), out_dtype),
        grid_spec=pltpu.PrefetchScalarGridSpec(
            num_scalar_prefetch=0,
            grid=grid,
            in_specs=[
                pl.BlockSpec((tm, D), lambda i: (i, 0)),        # row tile of data
                pl.BlockSpec((tm, 1), lambda i: (i, 0)),        # row tile of mask
                pl.BlockSpec((Tpad, D), lambda i: (0, 0)),      # weight stays resident
            ],
            out_specs=pl.BlockSpec((tm, Tpad), lambda i: (i, 0)),
        ),
        compiler_params=pltpu.CompilerParams(
            dimension_semantics=("parallel",),                  # megacore-shardable
        ),
    )(x, m, weight)

    # Drop row / type padding and restore (B, L-1, T).
    return out[:M, :T].reshape(B, L - 1, T)


if __name__ == "__main__":
    # Small shapes consistent with the module: batch=2, seq=8, hidden dim=32, num_types=16
    B, L, D, T = 2, 8, 32, 16
    key = jax.random.PRNGKey(0)
    k_data, k_w, k_mask = jax.random.split(key, 3)

    data = jax.random.normal(k_data, (B, L, D), dtype=jnp.float32)

    # nn.init.xavier_normal_ on weight of shape (num_types, dim):
    # std = gain * sqrt(2 / (fan_in + fan_out)) with gain=1
    xavier_std = math.sqrt(2.0 / (D + T))
    weight = xavier_std * jax.random.normal(k_w, (T, D), dtype=jnp.float32)

    # non_pad_mask: (B, L, 1), 1.0 for real tokens, 0.0 for padding
    non_pad_mask = (jax.random.uniform(k_mask, (B, L, 1)) > 0.25).astype(jnp.float32)

    # Reference in plain JAX (mirrors the PyTorch forward exactly)
    ref = (data @ weight.T)[:, :-1] * non_pad_mask[:, 1:]

    # f32 path (exact check)
    out = predictor_forward(data, non_pad_mask, weight)
    out = jax.block_until_ready(out)
    assert out.shape == (B, L - 1, T), out.shape
    assert jnp.allclose(out, ref, atol=1e-5, rtol=1e-5), "mismatch vs reference (f32)"

    # bf16 compute path (v6e/v7x memory-bandwidth optimization), loose tolerance
    out_bf16 = predictor_forward(data, non_pad_mask, weight, compute_dtype=jnp.bfloat16)
    out_bf16 = jax.block_until_ready(out_bf16)
    assert out_bf16.shape == (B, L - 1, T), out_bf16.shape
    assert jnp.allclose(out_bf16, ref, atol=1e-1, rtol=1e-1), "mismatch vs reference (bf16)"

    print("KERNEL_OK")
</pallas_src>

<mosaic_0001>
module attributes {stable_mosaic.version = 11 : i64} {
  func.func @_predictor_kernel(%arg0: i32, %arg1: memref<16x32xf32, #tpu.memory_space<vmem>>, %arg2: memref<16x1xf32, #tpu.memory_space<vmem>>, %arg3: memref<128x32xf32, #tpu.memory_space<vmem>>, %arg4: memref<16x128xf32, #tpu.memory_space<vmem>>) attributes {dimension_semantics = [#tpu.dimension_semantics<parallel>], iteration_bounds = array<i64: 1>, scalar_prefetch = 0 : i64, scratch_operands = 0 : i64, tpu.core_type = #tpu.core_type<tc>, window_params = [{transform_indices = @transform_0, window_bounds = array<i64: 16, 32>}, {transform_indices = @transform_1, window_bounds = array<i64: 16, 1>}, {pipeline_mode = #tpu.pipeline_mode<synchronous>, transform_indices = @transform_2, window_bounds = array<i64: 128, 32>}, {transform_indices = @transform_3, window_bounds = array<i64: 16, 128>}]} {
    %c0 = arith.constant 0 : index
    %c0_0 = arith.constant 0 : index
    %0 = vector.load %arg1[%c0, %c0_0] : memref<16x32xf32, #tpu.memory_space<vmem>>, vector<16x32xf32>
    %c0_1 = arith.constant 0 : index
    %c0_2 = arith.constant 0 : index
    %1 = vector.load %arg3[%c0_1, %c0_2] : memref<128x32xf32, #tpu.memory_space<vmem>>, vector<128x32xf32>
    %cst = arith.constant dense<0.000000e+00> : vector<16x128xf32>
    %2 = tpu.matmul %0, %1, %cst {dimension_numbers = #tpu.dot_dimension_numbers<[1], [1], [0], [0], [0, 0, 1, 0], [], []>} : vector<16x32xf32>, vector<128x32xf32>, vector<16x128xf32> -> vector<16x128xf32>
    %c0_3 = arith.constant 0 : index
    %c0_4 = arith.constant 0 : index
    %3 = vector.load %arg2[%c0_3, %c0_4] : memref<16x1xf32, #tpu.memory_space<vmem>>, vector<16x1xf32>
    %4 = vector.broadcast %3 : vector<16x1xf32> to vector<16x128xf32>
    %5 = arith.mulf %2, %4 : vector<16x128xf32>
    %c0_5 = arith.constant 0 : index
    %c0_6 = arith.constant 0 : index
    %6 = vector.load %arg4[%c0_5, %c0_6] : memref<16x128xf32, #tpu.memory_space<vmem>>, vector<16x128xf32>
    tpu.vector_store %arg4[%c0_5, %c0_6], %5 {strides = array<i32>} : memref<16x128xf32, #tpu.memory_space<vmem>>, vector<16x128xf32>,
    return
  }
  func.func @transform_0(%arg0: i32) -> (i32, i32) {
    %c0_i32 = arith.constant 0 : i32
    %c0_i32_0 = arith.constant 0 : i32
    return %arg0, %c0_i32 : i32, i32
  }
  func.func @transform_1(%arg0: i32) -> (i32, i32) {
    %c0_i32 = arith.constant 0 : i32
    %c0_i32_0 = arith.constant 0 : i32
    return %arg0, %c0_i32 : i32, i32
  }
  func.func @transform_2(%arg0: i32) -> (i32, i32) {
    %c0_i32 = arith.constant 0 : i32
    %c0_i32_0 = arith.constant 0 : i32
    %c0_i32_1 = arith.constant 0 : i32
    return %c0_i32, %c0_i32_0 : i32, i32
  }
  func.func @transform_3(%arg0: i32) -> (i32, i32) {
    %c0_i32 = arith.constant 0 : i32
    %c0_i32_0 = arith.constant 0 : i32
    return %arg0, %c0_i32 : i32, i32
  }
}

</mosaic_0001>

<bundles_post_ra>
// kernel: tpu_custom_call.1
= control target key start
LH: loop header
LB: loop body
LE: loop exit
PB: predicated region body
PF: predicated region fallthrough
CT: control target
= control target key end

     0   :  { %vm33_vm0 = vcmask 261120   ;;  %v343_v6 = vmov 0   ;;  %s479_s0 = inlined_call_operand.vmem [shape: f32[16,32], index: 0, kind: input, shape index: {}]   ;;  %s480_s1 = inlined_call_operand.vmem [shape: f32[16,1], index: 1, kind: input, shape index: {}]   ;;  %s481_s2 = inlined_call_operand.vmem [shape: f32[128,32], index: 2, kind: input, shape index: {}]   ;;  %s482_s3 = inlined_call_operand.hbm [shape: f32[16,128], index: 3, kind: output, shape index: {}]  }
   0x1   :  { %v17_v0 = vld [vmem:[%s481_s2] sm:$0xff]  ;;  %v18_v1 = vld [vmem:[%s481_s2 + $0x8] sm:$0xff]  ;;  %v19_v2 = vld [vmem:[%s481_s2 + $0x10] sm:$0xff]  ;;  %318 = vset.pattern.permute.xlu0 %v343_v6 }
   0x2   :  { %v266_v3 = vpack.c.bf16 %v18_v1, %v17_v0  ;;  %vm378_vm1 = vmpackc.low %vm33_vm0, %vm33_vm0  ;;  %v20_v5 = vld [vmem:[%s481_s2 + $0x18] sm:$0xff]  ;;  %v15_v8 = vld [vmem:[%s479_s0] sm:$0xff] }
   0x3   :  { %v272_v7 = vpack.c.bf16 %v20_v5, %v19_v2  ;;  %v21_v9 = vld [vmem:[%s481_s2 + $0x20] sm:$0xff]  ;;  %v22_v10 = vld [vmem:[%s481_s2 + $0x28] sm:$0xff]  ;;  %263 = vmatprep.mubr.msk.f32.mxu0 %vm33_vm0, %v15_v8 }
   0x4   :  { %268 = vmatprep.subr.msk.bf16.mxu0 %vm378_vm1, %v266_v3  ;;  %v163_v11 = vld [vmem:[%s480_s1] sm:$0xff] }
   0x5   :  { %271 = vmatpush3.bf16.xpose.msk.msra.mxu0 %vm378_vm1, %v266_v3  ;;  %167 = vperm.xlu0 %318, %v163_v11  }
   0x6   :  { %274 = vmatprep.subr.msk.bf16.mxu0 %vm378_vm1, %v272_v7 }
   0x7   :  { %8 = vsyncpa [#allocation3], 0  ;;  %v164_v12 = vld [vmem:[%s480_s1 + $0x8] sm:$0xff]  ;;  %v278_v13 = vpack.c.bf16 %v22_v10, %v21_v9  ;;  %v23_v14 = vld [vmem:[%s481_s2 + $0x30] sm:$0xff]  ;;  %s344_s24 = smov [#allocation2]  }
   0x8   :  { %v24_v15 = vld [vmem:[%s481_s2 + $0x38] sm:$0xff]  ;;  %v25_v17 = vld [vmem:[%s481_s2 + $0x40] sm:$0xff]  ;;  %v26_v18 = vld [vmem:[%s481_s2 + $0x48] sm:$0xff]  ;;  %s184_s25 = sshll.u32 %s344_s24, 4  ;;  %s185_s25 = int_to_ptr.vmem [resolvable:$true] %s184_s25 }
   0x9   :  { %172 = vperm.xlu0 %318, %v164_v12   ;;  %v284_v16 = vpack.c.bf16 %v24_v15, %v23_v14  ;;  %v290_v19 = vpack.c.bf16 %v26_v18, %v25_v17  ;;  %v27_v20 = vld [vmem:[%s481_s2 + $0x50] sm:$0xff]  ;;  %v28_v21 = vld [vmem:[%s481_s2 + $0x58] sm:$0xff]  ;;  %v29_v23 = vld [vmem:[%s481_s2 + $0x60] sm:$0xff]  ;;  %p324_p1 = scmp.lt.s32.totalorder %s185_s25, %s185_s25 }
   0xa   :  { %v296_v22 = vpack.c.bf16 %v28_v21, %v27_v20  ;;  %v30_v24 = vld [vmem:[%s481_s2 + $0x68] sm:$0xff]  ;;  %v31_v26 = vld [vmem:[%s481_s2 + $0x70] sm:$0xff]  ;;  %v32_v27 = vld [vmem:[%s481_s2 + $0x78] sm:$0xff]  ;;  %s319_s2 = scalar_lea.vmem %s185_s25, 256 }
   0xb   :  { %v302_v25 = vpack.c.bf16 %v30_v24, %v29_v23  ;;  %v308_v28 = vpack.c.bf16 %v32_v27, %v31_v26  ;;  %v16_v29 = vld [vmem:[%s479_s0 + $0x8] sm:$0xff]  ;;  %p320_p0 = scmp.ne.s32.totalorder %s185_s25, %s319_s2  ;;  %p325_p2 = scmp.lt.s32.totalorder %s319_s2, %s319_s2 }
   0xd   :  { %277 = vmatpush3.bf16.xpose.msk.msra.mxu0 %vm378_vm1, %v272_v7  ;;  %p326_p3 = por %p325_p2, %p324_p1 }
   0xe   :  { %280 = vmatprep.subr.msk.bf16.mxu0 %vm378_vm1, %v278_v13 }
   0xf   :  { %p327_p4 = pnand %p326_p3, %p320_p0 }
  0x15   :  { %283 = vmatpush3.bf16.xpose.msk.msra.mxu0 %vm378_vm1, %v278_v13 }
  0x16   :  { %286 = vmatprep.subr.msk.bf16.mxu0 %vm378_vm1, %v284_v16 }
  0x1d   :  { %289 = vmatpush3.bf16.xpose.msk.msra.mxu0 %vm378_vm1, %v284_v16 }
  0x1e   :  { %292 = vmatprep.subr.msk.bf16.mxu0 %vm378_vm1, %v290_v19 }
  0x25   :  { %295 = vmatpush3.bf16.xpose.msk.msra.mxu0 %vm378_vm1, %v290_v19 }
  0x26   :  { %298 = vmatprep.subr.msk.bf16.mxu0 %vm378_vm1, %v296_v22 }
  0x2d   :  { %301 = vmatpush3.bf16.xpose.msk.msra.mxu0 %vm378_vm1, %v296_v22 }
  0x2e   :  { %304 = vmatprep.subr.msk.bf16.mxu0 %vm378_vm1, %v302_v25 }
  0x35   :  { %307 = vmatpush3.bf16.xpose.msk.msra.mxu0 %vm378_vm1, %v302_v25 }
  0x36   :  { %310 = vmatprep.subr.msk.bf16.mxu0 %vm378_vm1, %v308_v28 }
  0x3d   :  { %313 = vmatpush3.bf16.xpose.msk.msra.mxu0 %vm378_vm1, %v308_v28 }
  0x44   :  { %264 = vmatmul.mubr.msk.f32.vlgmr.msra.gmra.mrb[0].mxu0 %vm33_vm0, %v16_v29 }
  0x84   :  { %v168_v30 = vpop.permute.xlu0 %167 }
  0x88   :  { %v173_v31 = vpop.permute.xlu0 %172 }
 0x117   :  { %v265_v32 = vpop.f32.mrb[0].mxu0 }
 0x118   :  { %v176_v33 = vmul.f32 %v265_v32, %v173_v31  ;;  %v154_v34 = vpop.f32.mrb[1].mxu0 }
 0x119   :  { %v175_v35 = vmul.f32 %v168_v30, %v154_v34 }
 0x11a   :  { %178 = vst [vmem:[#allocation2 + $0x8] sm:$0xff] %v176_v33 }
 0x11b   :  { %177 = vst [vmem:[#allocation2] sm:$0xff] %v175_v35 }
 0x11c   :  { %330 = shalt.err (!%p327_p4)
}
 0x11d   :  { %s331_s27 = scalar_lea.hbm %s482_s3, 256 }
 0x11e   :  { %p332_p5 = scmp.ne.s32.totalorder %s482_s3, %s331_s27  ;;  %p335_p6 = scmp.lt.u32.totalorder %s331_s27, %s482_s3 }
 0x120   :  { %p337_p7 = pnand %p335_p6, %p332_p5 }
 0x122   :  { %340 = shalt.err (!%p337_p7)
}
 0x123   :  { %s345_s5 = smov 128   ;;  %s346_s6 = smov 8  }
 0x124   :  { %190 = dma.vmem_to_hbm [thread:$0]  %s185_s25, 256, %s482_s3, [#allocation3], %s345_s5, %s345_s5, %s346_s6  }
 0x125   :  { %341 = dma.done.wait [#allocation3], 256  }
 0x126   :  { %342 = vsyncadd [#allocation3], 4294967040 }
 0x127   :  { %194 = vsyncpa [#allocation3], 1 }

</bundles_post_ra>
